<compile_context>
chip_gen: v5e
topology: v5e:2x2
jax: 0.10.0
libtpu: 0.0.40
codegen_flags: <defaults>
</compile_context>

<pallas_src>
import functools

import jax
import jax.numpy as jnp
from jax.experimental import pallas as pl
from jax.experimental.pallas import tpu as pltpu

_LANE = 128
_SUBLANE = 8


def _round_up(x, m):
    return (x + m - 1) // m * m


def _actor_kernel(x_ref, w_ref, b_ref, out_ref, *, out_size):
    x = x_ref[...]                                        # (TB, D)

    # layer 0: input layer + ReLU
    l1 = jnp.dot(x, w_ref[0], preferred_element_type=jnp.float32)
    l1 = jnp.maximum(l1 + b_ref[0:1, :], 0.0)

    # layer 1: both middle heads fused into one matmul + ReLU
    l2 = jnp.dot(l1, w_ref[1], preferred_element_type=jnp.float32)
    l2 = jnp.maximum(l2 + b_ref[1:2, :], 0.0)

    # layer 2: both output heads fused (block-diagonal weights)
    z = jnp.dot(l2, w_ref[2], preferred_element_type=jnp.float32) + b_ref[2:3, :]

    # cols [0, out) -> tanh (mu head); cols [out, 2*out) -> sigmoid (sigma head)
    col = jax.lax.broadcasted_iota(jnp.int32, z.shape, 1)
    out = jnp.where(col < out_size, jnp.tanh(z), jax.nn.sigmoid(z))
    out_ref[...] = out.astype(out_ref.dtype)


def init_actor_params(key, input_size, output_size, hidden_units):
    """Deterministic param init (PyTorch Linear-style uniform bounds).

    Weights are stored already transposed to (in, out); biases as (1, out)."""
    dims = [
        (input_size, hidden_units[0]),       # input_layer
        (hidden_units[0], hidden_units[1]),  # middle_layer_head_1
        (hidden_units[1], output_size),      # output_layer_head_1
        (hidden_units[0], hidden_units[1]),  # middle_layer_head_2
        (hidden_units[1], output_size),      # output_layer_head_2
    ]
    params = []
    for (fan_in, fan_out) in dims:
        key, kw, kb = jax.random.split(key, 3)
        bound = 1.0 / jnp.sqrt(float(fan_in))
        w = jax.random.uniform(kw, (fan_in, fan_out), jnp.float32, -bound, bound)
        b = jax.random.uniform(kb, (1, fan_out), jnp.float32, -bound, bound)
        params.append((w, b))
    return params


def pack_actor_params(params, input_size, output_size, hidden_units):
    """One-time packing of the 5 Linear layers into lane-padded fused slabs."""
    (w_in, b_in), (w_m1, b_m1), (w_o1, b_o1), (w_m2, b_m2), (w_o2, b_o2) = params
    h0, h1 = hidden_units
    D = _round_up(max(input_size, h0, 2 * h1, 2 * output_size), _LANE)

    w = jnp.zeros((3, D, D), jnp.float32)
    b = jnp.zeros((3, D), jnp.float32)

    # layer 0: input layer
    w = w.at[0, :input_size, :h0].set(w_in)
    b = b.at[0, :h0].set(b_in.reshape(-1))

    # layer 1: fused middle heads (mu head cols [0,h1), sigma head cols [h1,2*h1))
    w = w.at[1, :h0, :h1].set(w_m1)
    w = w.at[1, :h0, h1:2 * h1].set(w_m2)
    b = b.at[1, :h1].set(b_m1.reshape(-1))
    b = b.at[1, h1:2 * h1].set(b_m2.reshape(-1))

    # layer 2: fused output heads, block diagonal
    w = w.at[2, :h1, :output_size].set(w_o1)
    w = w.at[2, h1:2 * h1, output_size:2 * output_size].set(w_o2)
    b = b.at[2, :output_size].set(b_o1.reshape(-1))
    b = b.at[2, output_size:2 * output_size].set(b_o2.reshape(-1))

    return {"w": w, "b": b, "out_size": output_size, "dim": D}


def actor_forward(x, packed, *, batch_tile=256):
    """x: (batch, input_size) -> (mu, sigma), each (batch, output_size)."""
    w, b = packed["w"], packed["b"]
    out_size, D = packed["out_size"], packed["dim"]
    batch, in_size = x.shape

    # Pad batch to a sublane-aligned, tile-divisible size and features to D.
    pb = _round_up(batch, _SUBLANE)
    tb = min(batch_tile, pb)
    pb = _round_up(pb, tb)
    x_pad = jnp.zeros((pb, D), jnp.float32)
    x_pad = x_pad.at[:batch, :in_size].set(x.astype(jnp.float32))

    grid = (pb // tb,)
    kernel = functools.partial(_actor_kernel, out_size=out_size)

    flops = 2 * pb * D * D * 3
    transcendentals = 2 * pb * D                      # tanh + sigmoid
    bytes_accessed = 4 * (2 * pb * D + 3 * D * D + 3 * D)

    out = pl.pallas_call(
        kernel,
        out_shape=jax.ShapeDtypeStruct((pb, D), jnp.float32),
        grid=grid,
        in_specs=[
            pl.BlockSpec((tb, D), lambda i: (i, 0)),        # x tile
            pl.BlockSpec((3, D, D), lambda i: (0, 0, 0)),   # weight slab (resident)
            pl.BlockSpec((3, D), lambda i: (0, 0)),         # bias slab (resident)
        ],
        out_specs=pl.BlockSpec((tb, D), lambda i: (i, 0)),
        compiler_params=pltpu.CompilerParams(
            dimension_semantics=("parallel",)),
        cost_estimate=pl.CostEstimate(
            flops=flops,
            transcendentals=transcendentals,
            bytes_accessed=bytes_accessed),
    )(x_pad, w, b)

    mu = out[:batch, :out_size]
    sigma = out[:batch, out_size:2 * out_size]
    return mu, sigma


def actor_forward_ref(x, params):
    """Pure-JAX reference for correctness checking."""
    (w_in, b_in), (w_m1, b_m1), (w_o1, b_o1), (w_m2, b_m2), (w_o2, b_o2) = params
    l1 = jax.nn.relu(x @ w_in + b_in)
    l2_mu = jax.nn.relu(l1 @ w_m1 + b_m1)
    mu = jnp.tanh(l2_mu @ w_o1 + b_o1)
    l2_sg = jax.nn.relu(l1 @ w_m2 + b_m2)
    sigma = jax.nn.sigmoid(l2_sg @ w_o2 + b_o2)
    return mu, sigma


if __name__ == "__main__":
    # Small shapes consistent with the module (LunarLanderContinuous-ish actor):
    # state dim 8, action dim 2, hidden_units = [32, 32], batch 2.
    batch, input_size, output_size = 2, 8, 2
    hidden_units = [32, 32]

    key = jax.random.PRNGKey(0)
    key, kx = jax.random.split(key)
    x = jax.random.normal(kx, (batch, input_size), jnp.float32)
    params = init_actor_params(key, input_size, output_size, hidden_units)
    packed = pack_actor_params(params, input_size, output_size, hidden_units)

    mu, sigma = actor_forward(x, packed)
    jax.block_until_ready((mu, sigma))

    mu_ref, sigma_ref = actor_forward_ref(x, params)
    assert mu.shape == (batch, output_size) and sigma.shape == (batch, output_size)
    assert jnp.allclose(mu, mu_ref, atol=1e-5, rtol=1e-5)
    assert jnp.allclose(sigma, sigma_ref, atol=1e-5, rtol=1e-5)

    print("KERNEL_OK")
</pallas_src>

<mosaic_0001>
module attributes {stable_mosaic.version = 11 : i64} {
  func.func @_actor_kernel(%arg0: i32, %arg1: memref<8x128xf32, #tpu.memory_space<vmem>>, %arg2: memref<3x128x128xf32, #tpu.memory_space<vmem>>, %arg3: memref<3x128xf32, #tpu.memory_space<vmem>>, %arg4: memref<8x128xf32, #tpu.memory_space<vmem>>) attributes {dimension_semantics = [#tpu.dimension_semantics<parallel>], iteration_bounds = array<i64: 1>, scalar_prefetch = 0 : i64, scratch_operands = 0 : i64, tpu.core_type = #tpu.core_type<tc>, window_params = [{transform_indices = @transform_0, window_bounds = array<i64: 8, 128>}, {pipeline_mode = #tpu.pipeline_mode<synchronous>, transform_indices = @transform_1, window_bounds = array<i64: 3, 128, 128>}, {pipeline_mode = #tpu.pipeline_mode<synchronous>, transform_indices = @transform_2, window_bounds = array<i64: 3, 128>}, {transform_indices = @transform_3, window_bounds = array<i64: 8, 128>}]} {
    %c0 = arith.constant 0 : index
    %c0_0 = arith.constant 0 : index
    %0 = vector.load %arg1[%c0, %c0_0] : memref<8x128xf32, #tpu.memory_space<vmem>>, vector<8x128xf32>
    %c0_1 = arith.constant 0 : index
    %c0_2 = arith.constant 0 : index
    %c0_3 = arith.constant 0 : index
    %1 = vector.load %arg2[%c0_1, %c0_2, %c0_3] : memref<3x128x128xf32, #tpu.memory_space<vmem>>, vector<1x128x128xf32>
    %2 = vector.shape_cast %1 : vector<1x128x128xf32> to vector<128x128xf32>
    %cst = arith.constant dense<0.000000e+00> : vector<8x128xf32>
    %3 = tpu.matmul %0, %2, %cst {dimension_numbers = #tpu.dot_dimension_numbers<[1], [0], [0], [1], [0, 0, 1, 1], [], []>} : vector<8x128xf32>, vector<128x128xf32>, vector<8x128xf32> -> vector<8x128xf32>
    %c0_4 = arith.constant 0 : index
    %c0_5 = arith.constant 0 : index
    %4 = vector.load %arg3[%c0_4, %c0_5] : memref<3x128xf32, #tpu.memory_space<vmem>>, vector<1x128xf32>
    %5 = vector.broadcast %4 : vector<1x128xf32> to vector<8x128xf32>
    %6 = arith.addf %3, %5 : vector<8x128xf32>
    %cst_6 = arith.constant 0.000000e+00 : f32
    %7 = vector.broadcast %cst_6 : f32 to vector<8x128xf32>
    %8 = arith.maximumf %6, %7 : vector<8x128xf32>
    %c1 = arith.constant 1 : index
    %c0_7 = arith.constant 0 : index
    %c0_8 = arith.constant 0 : index
    %9 = vector.load %arg2[%c1, %c0_7, %c0_8] : memref<3x128x128xf32, #tpu.memory_space<vmem>>, vector<1x128x128xf32>
    %10 = vector.shape_cast %9 : vector<1x128x128xf32> to vector<128x128xf32>
    %cst_9 = arith.constant dense<0.000000e+00> : vector<8x128xf32>
    %11 = tpu.matmul %8, %10, %cst_9 {dimension_numbers = #tpu.dot_dimension_numbers<[1], [0], [0], [1], [0, 0, 1, 1], [], []>} : vector<8x128xf32>, vector<128x128xf32>, vector<8x128xf32> -> vector<8x128xf32>
    %c1_10 = arith.constant 1 : index
    %c0_11 = arith.constant 0 : index
    %12 = vector.load %arg3[%c1_10, %c0_11] : memref<3x128xf32, #tpu.memory_space<vmem>>, vector<1x128xf32>
    %13 = vector.broadcast %12 : vector<1x128xf32> to vector<8x128xf32>
    %14 = arith.addf %11, %13 : vector<8x128xf32>
    %cst_12 = arith.constant 0.000000e+00 : f32
    %15 = vector.broadcast %cst_12 : f32 to vector<8x128xf32>
    %16 = arith.maximumf %14, %15 : vector<8x128xf32>
    %c2 = arith.constant 2 : index
    %c0_13 = arith.constant 0 : index
    %c0_14 = arith.constant 0 : index
    %17 = vector.load %arg2[%c2, %c0_13, %c0_14] : memref<3x128x128xf32, #tpu.memory_space<vmem>>, vector<1x128x128xf32>
    %18 = vector.shape_cast %17 : vector<1x128x128xf32> to vector<128x128xf32>
    %cst_15 = arith.constant dense<0.000000e+00> : vector<8x128xf32>
    %19 = tpu.matmul %16, %18, %cst_15 {dimension_numbers = #tpu.dot_dimension_numbers<[1], [0], [0], [1], [0, 0, 1, 1], [], []>} : vector<8x128xf32>, vector<128x128xf32>, vector<8x128xf32> -> vector<8x128xf32>
    %c2_16 = arith.constant 2 : index
    %c0_17 = arith.constant 0 : index
    %20 = vector.load %arg3[%c2_16, %c0_17] : memref<3x128xf32, #tpu.memory_space<vmem>>, vector<1x128xf32>
    %21 = vector.broadcast %20 : vector<1x128xf32> to vector<8x128xf32>
    %22 = arith.addf %19, %21 : vector<8x128xf32>
    %23 = tpu.iota {dimensions = array<i32: 1>} : vector<8x128xi32>
    %c2_i32 = arith.constant 2 : i32
    %24 = vector.broadcast %c2_i32 : i32 to vector<8x128xi32>
    %25 = arith.cmpi slt, %23, %24 : vector<8x128xi32>
    %26 = math.tanh %22 : vector<8x128xf32>
    %27 = arith.negf %22 : vector<8x128xf32>
    %28 = math.exp %27 : vector<8x128xf32>
    %cst_18 = arith.constant 1.000000e+00 : f32
    %29 = vector.broadcast %cst_18 : f32 to vector<8x128xf32>
    %30 = arith.addf %29, %28 : vector<8x128xf32>
    %31 = arith.divf %29, %30 : vector<8x128xf32>
    %32 = arith.select %25, %26, %31 : vector<8x128xi1>, vector<8x128xf32>
    %c0_19 = arith.constant 0 : index
    %c0_20 = arith.constant 0 : index
    %33 = vector.load %arg4[%c0_19, %c0_20] : memref<8x128xf32, #tpu.memory_space<vmem>>, vector<8x128xf32>
    tpu.vector_store %arg4[%c0_19, %c0_20], %32 {strides = array<i32>} : memref<8x128xf32, #tpu.memory_space<vmem>>, vector<8x128xf32>,
    return
  }
  func.func @transform_0(%arg0: i32) -> (i32, i32) {
    %c0_i32 = arith.constant 0 : i32
    %c0_i32_0 = arith.constant 0 : i32
    return %arg0, %c0_i32 : i32, i32
  }
  func.func @transform_1(%arg0: i32) -> (i32, i32, i32) {
    %c0_i32 = arith.constant 0 : i32
    %c0_i32_0 = arith.constant 0 : i32
    %c0_i32_1 = arith.constant 0 : i32
    %c0_i32_2 = arith.constant 0 : i32
    return %c0_i32, %c0_i32_0, %c0_i32_1 : i32, i32, i32
  }
  func.func @transform_2(%arg0: i32) -> (i32, i32) {
    %c0_i32 = arith.constant 0 : i32
    %c0_i32_0 = arith.constant 0 : i32
    %c0_i32_1 = arith.constant 0 : i32
    return %c0_i32, %c0_i32_0 : i32, i32
  }
  func.func @transform_3(%arg0: i32) -> (i32, i32) {
    %c0_i32 = arith.constant 0 : i32
    %c0_i32_0 = arith.constant 0 : i32
    return %arg0, %c0_i32 : i32, i32
  }
}

</mosaic_0001>

<bundles_post_ra>
// kernel: tpu_custom_call.1
= control target key start
LH: loop header
LB: loop body
LE: loop exit
PB: predicated region body
PF: predicated region fallthrough
CT: control target
= control target key end

     0   :  { %8 = vsyncpa [#allocation3], 0  ;;  %s376_s0 = inlined_call_operand.hbm [shape: f32[8,128], index: 0, kind: input, shape index: {}]   ;;  %s377_s1 = inlined_call_operand.hbm [shape: f32[3,128,128], index: 1, kind: input, shape index: {}]   ;;  %s378_s2 = inlined_call_operand.hbm [shape: f32[3,128], index: 2, kind: input, shape index: {}]   ;;  %s379_s3 = inlined_call_operand.hbm [shape: f32[8,128], index: 3, kind: output, shape index: {}]  }
   0x1   :  { %9 = vsyncpa [#allocation6], 0  ;;  %s26_s14 = sshll.u32 %s377_s1, 4  ;;  %s27_s14 = int_to_ptr.hbm [resolvable:$true] %s26_s14 }
   0x2   :  { %10 = vsyncpa [#allocation4], 0  ;;  %s338_s15 = smov [#allocation5]   ;;  %s16_s19 = sshll.u32 %s376_s0, 4  ;;  %s17_s19 = int_to_ptr.hbm [resolvable:$true] %s16_s19 }
   0x3   :  { %s28_s16 = sshll.u32 %s338_s15, 4  ;;  %s339_s20 = smov 128   ;;  %s29_s16 = int_to_ptr.vmem [resolvable:$true] %s28_s16 }
   0x4   :  { %s340_s21 = smov 8   ;;  %s341_s22 = smov [#allocation2]  }
   0x5   :  { %34 = dma.hbm_to_vmem [thread:$0]  %s27_s14, 6144, %s29_s16, [#allocation6], %s339_s20, %s339_s20, %s340_s21  }
   0x6   :  { %s18_s23 = sshll.u32 %s341_s22, 4  ;;  %s40_s26 = sshll.u32 %s378_s2, 4  ;;  %s19_s23 = int_to_ptr.vmem [resolvable:$true] %s18_s23  ;;  %s41_s26 = int_to_ptr.hbm [resolvable:$true] %s40_s26 }
   0x7   :  { %21 = dma.hbm_to_vmem [thread:$0]  %s17_s19, 128, %s19_s23, [#allocation3]  }
   0x8   :  { %s342_s1 = smov [#allocation7]  }
   0x9   :  { %s42_s27 = sshll.u32 %s342_s1, 4  ;;  %s43_s27 = int_to_ptr.vmem [resolvable:$true] %s42_s27 }
   0xa   :  { %45 = dma.hbm_to_vmem [thread:$0]  %s41_s26, 64, %s43_s27, [#allocation6]  }
   0xb   :  { %332 = dma.done.wait [#allocation3], 128  }
   0xc   :  { %333 = vsyncadd [#allocation3], 4294967168 }
   0xd   :  { %334 = dma.done.wait [#allocation6], 6208  }
   0xe   :  { %335 = vsyncadd [#allocation6], 4294961088  ;;  %v74_v0 = vld [vmem:[#allocation5 + $0x78] sm:$0xff]  ;;  %v73_v1 = vld [vmem:[#allocation5 + $0x70] sm:$0xff]  ;;  %s343_s0 = smov [#allocation8]   ;;  %s209_s30 = sshll.u32 %s379_s3, 4  ;;  %s210_s30 = int_to_ptr.hbm [resolvable:$true] %s209_s30 }
   0xf   :  { %77 = vmatpush.msra.mxu0 %v74_v0  ;;  %v72_v2 = vld [vmem:[#allocation5 + $0x68] sm:$0xff]  ;;  %v71_v3 = vld [vmem:[#allocation5 + $0x60] sm:$0xff]  ;;  %v114_v4 = vld [vmem:[#allocation5 + $0xf8] sm:$0xff]  ;;  %v177_v0 = vlaneseq  ;;  %s207_s2 = sshll.u32 %s343_s0, 4  ;;  %s208_s2 = int_to_ptr.vmem [resolvable:$true] %s207_s2 }
  0x10   :  { %v70_v5 = vld [vmem:[#allocation5 + $0x58] sm:$0xff]  ;;  %117 = vmatpush.msra.mxu1 %v114_v4  ;;  %v113_v6 = vld [vmem:[#allocation5 + $0xf0] sm:$0xff]  ;;  %v112_v7 = vld [vmem:[#allocation5 + $0xe8] sm:$0xff] }
  0x11   :  { %78 = vmatpush.msra.mxu0 %v73_v1  ;;  %v69_v8 = vld [vmem:[#allocation5 + $0x50] sm:$0xff]  ;;  %v111_v9 = vld [vmem:[#allocation5 + $0xe0] sm:$0xff]  ;;  %v68_v10 = vld [vmem:[#allocation5 + $0x48] sm:$0xff] }
  0x12   :  { %118 = vmatpush.msra.mxu1 %v113_v6  ;;  %v110_v11 = vld [vmem:[#allocation5 + $0xd8] sm:$0xff]  ;;  %v67_v12 = vld [vmem:[#allocation5 + $0x40] sm:$0xff]  ;;  %v109_v13 = vld [vmem:[#allocation5 + $0xd0] sm:$0xff] }
  0x13   :  { %79 = vmatpush.msra.mxu0 %v72_v2  ;;  %v66_v14 = vld [vmem:[#allocation5 + $0x38] sm:$0xff]  ;;  %v108_v15 = vld [vmem:[#allocation5 + $0xc8] sm:$0xff]  ;;  %v65_v16 = vld [vmem:[#allocation5 + $0x30] sm:$0xff] }
  0x14   :  { %119 = vmatpush.msra.mxu1 %v112_v7  ;;  %v107_v17 = vld [vmem:[#allocation5 + $0xc0] sm:$0xff]  ;;  %v64_v18 = vld [vmem:[#allocation5 + $0x28] sm:$0xff]  ;;  %v106_v19 = vld [vmem:[#allocation5 + $0xb8] sm:$0xff] }
  0x15   :  { %80 = vmatpush.msra.mxu0 %v71_v3  ;;  %v63_v20 = vld [vmem:[#allocation5 + $0x20] sm:$0xff]  ;;  %v105_v21 = vld [vmem:[#allocation5 + $0xb0] sm:$0xff]  ;;  %v62_v22 = vld [vmem:[#allocation5 + $0x18] sm:$0xff]  ;;  %v178_v3 = vand.u32 127, %v177_v0 }
  0x16   :  { %120 = vmatpush.msra.mxu1 %v111_v9  ;;  %v104_v23 = vld [vmem:[#allocation5 + $0xa8] sm:$0xff]  ;;  %v61_v24 = vld [vmem:[#allocation5 + $0x10] sm:$0xff]  ;;  %v103_v25 = vld [vmem:[#allocation5 + $0xa0] sm:$0xff] }
  0x17   :  { %81 = vmatpush.msra.mxu0 %v70_v5  ;;  %v60_v26 = vld [vmem:[#allocation5 + $0x8] sm:$0xff]  ;;  %v102_v27 = vld [vmem:[#allocation5 + $0x98] sm:$0xff]  ;;  %v59_v28 = vld [vmem:[#allocation5] sm:$0xff]  ;;  %vm179_vm2 = vcmp.lt.s32.totalorder %v178_v3, 2 }
  0x18   :  { %121 = vmatpush.msra.mxu1 %v110_v11  ;;  %v58_v29 = vld [vmem:[#allocation2] sm:$0xff]  ;;  %v101_v30 = vld [vmem:[#allocation5 + $0x90] sm:$0xff]  ;;  %v100_v31 = vld [vmem:[#allocation5 + $0x88] sm:$0xff] }
  0x19   :  { %82 = vmatpush.msra.mxu0 %v69_v8  ;;  %v99_v32 = vld [vmem:[#allocation5 + $0x80] sm:$0xff]  ;;  %v154_v33 = vld [vmem:[#allocation5 + $0x178] sm:$0xff]  ;;  %v153_v34 = vld [vmem:[#allocation5 + $0x170] sm:$0xff] }
  0x1a   :  { %122 = vmatpush.msra.mxu1 %v109_v13  ;;  %157 = vmatpush.msra.mxu2 %v154_v33  ;;  %v152_v35 = vld [vmem:[#allocation5 + $0x168] sm:$0xff]  ;;  %v151_v36 = vld [vmem:[#allocation5 + $0x160] sm:$0xff]  ;;  %v150_v37 = vld [vmem:[#allocation5 + $0x158] sm:$0xff] }
  0x1b   :  { %83 = vmatpush.msra.mxu0 %v68_v10  ;;  %v149_v38 = vld [vmem:[#allocation5 + $0x150] sm:$0xff]  ;;  %v148_v39 = vld [vmem:[#allocation5 + $0x148] sm:$0xff]  ;;  %v147_v40 = vld [vmem:[#allocation5 + $0x140] sm:$0xff] }
  0x1c   :  { %123 = vmatpush.msra.mxu1 %v108_v15  ;;  %158 = vmatpush.msra.mxu2 %v153_v34  ;;  %v146_v41 = vld [vmem:[#allocation5 + $0x138] sm:$0xff]  ;;  %v145_v42 = vld [vmem:[#allocation5 + $0x130] sm:$0xff]  ;;  %v144_v43 = vld [vmem:[#allocation5 + $0x128] sm:$0xff] }
  0x1d   :  { %84 = vmatpush.msra.mxu0 %v67_v12  ;;  %v143_v44 = vld [vmem:[#allocation5 + $0x120] sm:$0xff]  ;;  %v142_v45 = vld [vmem:[#allocation5 + $0x118] sm:$0xff]  ;;  %v141_v50 = vld [vmem:[#allocation5 + $0x110] sm:$0xff] }
  0x1e   :  { %124 = vmatpush.msra.mxu1 %v107_v17  ;;  %159 = vmatpush.msra.mxu2 %v152_v35  ;;  %v227_v46 = vld [vmem:[#allocation7] ss:$0 sm:$0xff]  ;;  %v140_v51 = vld [vmem:[#allocation5 + $0x108] sm:$0xff]  ;;  %v228_v53 = vld [vmem:[#allocation7 + $0x1] ss:$0 sm:$0xff] }
  0x1f   :  { %85 = vmatpush.msra.mxu0 %v66_v14  ;;  %v139_v52 = vld [vmem:[#allocation5 + $0x100] sm:$0xff] }
  0x20   :  { %125 = vmatpush.msra.mxu1 %v106_v19  ;;  %160 = vmatpush.msra.mxu2 %v151_v36  ;;  %v229_v57 = vld [vmem:[#allocation7 + $0x2] ss:$0 sm:$0xff] }
  0x21   :  { %86 = vmatpush.msra.mxu0 %v65_v16 }
  0x22   :  { %126 = vmatpush.msra.mxu1 %v105_v21  ;;  %161 = vmatpush.msra.mxu2 %v150_v37 }
  0x23   :  { %87 = vmatpush.msra.mxu0 %v64_v18 }
  0x24   :  { %127 = vmatpush.msra.mxu1 %v104_v23  ;;  %162 = vmatpush.msra.mxu2 %v149_v38 }
  0x25   :  { %88 = vmatpush.msra.mxu0 %v63_v20 }
  0x26   :  { %128 = vmatpush.msra.mxu1 %v103_v25  ;;  %163 = vmatpush.msra.mxu2 %v148_v39 }
  0x27   :  { %89 = vmatpush.msra.mxu0 %v62_v22 }
  0x28   :  { %129 = vmatpush.msra.mxu1 %v102_v27  ;;  %164 = vmatpush.msra.mxu2 %v147_v40 }
  0x29   :  { %90 = vmatpush.msra.mxu0 %v61_v24 }
  0x2a   :  { %130 = vmatpush.msra.mxu1 %v101_v30  ;;  %165 = vmatpush.msra.mxu2 %v146_v41 }
  0x2b   :  { %91 = vmatpush.msra.mxu0 %v60_v26 }
  0x2c   :  { %131 = vmatpush.msra.mxu1 %v100_v31  ;;  %166 = vmatpush.msra.mxu2 %v145_v42 }
  0x2d   :  { %92 = vmatpush.msra.mxu0 %v59_v28 }
  0x2e   :  { %93 = vmatmul.f32.vlgmr.msra.gmra.mxu0 %v58_v29  ;;  %132 = vmatpush.msra.mxu1 %v99_v32 }
  0x2f   :  { %167 = vmatpush.msra.mxu2 %v144_v43 }
  0x31   :  { %168 = vmatpush.msra.mxu2 %v143_v44 }
  0x33   :  { %169 = vmatpush.msra.mxu2 %v142_v45 }
  0x35   :  { %170 = vmatpush.msra.mxu2 %v141_v50 }
  0x37   :  { %171 = vmatpush.msra.mxu2 %v140_v51 }
  0x39   :  { %172 = vmatpush.msra.mxu2 %v139_v52 }
  0xab   :  { %v94_v47 = vpop.f32.mrf.mxu0 }
  0xac   :  { %v95_v48 = vadd.f32 %v227_v46, %v94_v47 }
  0xae   :  { %v97_v49 = vmax.f32 %v95_v48, 0.0 }
  0xb0   :  { %133 = vmatmul.f32.vlgmr.msra.gmra.mxu1 %v97_v49 }
 0x12d   :  { %v134_v54 = vpop.f32.mrf.mxu1 }
 0x12e   :  { %v135_v55 = vadd.f32 %v228_v53, %v134_v54 }
 0x130   :  { %v137_v56 = vmax.f32 %v135_v55, 0.0 }
 0x132   :  { %173 = vmatmul.f32.vlgmr.msra.gmra.mxu2 %v137_v56 }
 0x1b5   :  { %v174_v58 = vpop.f32.mrf.mxu2 }
 0x1b6   :  { %v175_v59 = vadd.f32 %v229_v57, %v174_v58 }
 0x1b8   :  { %v220_v60 = vmul.f32 -1.442695, %v175_v59 }
 0x1ba   :  { %230 = vpow2.f32 %v220_v60 }
 0x1c0   :  { %v231_v61 = vpop.eup %230 }
 0x1c1   :  { %v184_v62 = vadd.f32 1.0, %v231_v61 }
 0x1c3   :  { %232 = vrcp.f32 %v184_v62  ;;  %v196_v4 = vand.u32 2147483648, %v184_v62  ;;  %v194_v6 = vand.u32 2147483647, %v184_v62  ;;  %vm190_vm1 = vweird.f32 %v184_v62 }
 0x1c4   :  { %234 = vtanh.f32 %v175_v59 }
 0x1c5   :  { %v197_v8 = vor.u32 1.1754944e-38, %v196_v4  ;;  %vm195_vm4 = vcmp.eq.f32.partialorder %v194_v6, 8.507059e+37 }
 0x1c9   :  { %v233_v63 = vpop.eup %232 }
 0x1ca   :  { %v186_v1 = vmul.f32 %v233_v63, %v184_v62  ;;  %vm191_vm0 = vweird.f32 %v233_v63  ;;  %v235_v10 = vpop.eup %234 }
 0x1cb   :  { %vm192_vm3 = vmor %vm190_vm1, %vm191_vm0 }
 0x1cc   :  { %v187_v2 = vsub.f32 1.0, %v186_v1 }
 0x1ce   :  { %v188_v5 = vmul.f32 %v233_v63, %v187_v2 }
 0x1d0   :  { %v189_v7 = vadd.f32 %v233_v63, %v188_v5 }
 0x1d2   :  { %v193_v9 = vsel %vm192_vm3, %v233_v63, %v189_v7 }
 0x1d3   :  { %v198_v11 = vsel %vm195_vm4, %v197_v8, %v193_v9 }
 0x1d4   :  { %v200_v12 = vsel %vm179_vm2, %v235_v10, %v198_v11 }
 0x1d5   :  { %201 = vst [vmem:[#allocation8] sm:$0xff] %v200_v12 }
 0x1d6   :  { %212 = dma.vmem_to_hbm [thread:$0]  %s208_s2, 128, %s210_s30, [#allocation4]  }
 0x1d7   :  { %336 = dma.done.wait [#allocation4], 128  }
 0x1d8   :  { %337 = vsyncadd [#allocation4], 4294967168 }
 0x1d9   :  { %217 = vsyncpa [#allocation3], 1 }
 0x1da   :  { %218 = vsyncpa [#allocation6], 1 }
 0x1db   :  { %219 = vsyncpa [#allocation4], 1 }

</bundles_post_ra>
